<compile_context>
chip_gen: v7x
topology: tpu7x:2x2x1
jax: 0.10.0
libtpu: 0.0.40
codegen_flags: <defaults>
</compile_context>

<pallas_src>
import jax
import jax.numpy as jnp
from jax.experimental import pallas as pl
from jax.experimental.pallas import tpu as pltpu


def _neg_kernel(x_ref, o_ref):
    # Pure VPU elementwise negate; the kernel is HBM-bandwidth bound.
    o_ref[...] = -x_ref[...]


def _sublane_multiple(dtype) -> int:
    itemsize = jnp.dtype(dtype).itemsize
    return {4: 8, 2: 16, 1: 32}.get(itemsize, 8)


_LANE_CANDIDATES = (2048, 1024, 512, 256, 128)
_TARGET_BLOCK_BYTES = 2 * 1024 * 1024  # ~2 MiB/block; 2x(in+out) buffers ~ 8 MiB.


def neg_pallas(x: jax.Array,
               *,
               min_pallas_bytes: int = 256 * 1024,
               block_bytes: int = _TARGET_BLOCK_BYTES) -> jax.Array:
    """Return -x.

    Uses a Pallas TPU kernel whenever a pure-reshape, lane-dense 2-D layout is
    possible (element count divisible by a 128-multiple lane width); tiny or
    non-lane-tileable inputs fall back to plain jnp negation (a wrapper-side
    pad/slice would cost more HBM traffic than it saves).
    """
    n = x.size
    itemsize = jnp.dtype(x.dtype).itemsize
    sub = _sublane_multiple(x.dtype)

    # Small-input fallback: pipeline setup + bookkeeping beats any gain.
    if n == 0 or n * itemsize < min_pallas_bytes:
        return -x

    # Pick the widest lane (last) dim that lets us tile with a pure reshape
    # (no pad/concatenate, no trailing slice -> no extra HBM passes).
    lanes = None
    for cand in _LANE_CANDIDATES:
        if n % cand == 0:
            lanes = cand
            break
    if lanes is None:
        # Element count not divisible by 128: let XLA do the negate.
        return -x

    rows = n // lanes

    if rows <= sub:
        # Single full-extent block (block_shape == array shape is always legal).
        tr = rows
    else:
        # Row-tile sized for ~block_bytes, rounded down to the sublane multiple
        # so every non-final block is (sub-multiple, 128-multiple); the ragged
        # final block (if any) is handled by Pallas boundary masking.
        target_rows = max(sub, (block_bytes // (lanes * itemsize)) // sub * sub)
        tr = min(target_rows, (rows // sub) * sub)

    x2d = x.reshape(rows, lanes)   # pure reshape: free (no data movement)
    grid = (pl.cdiv(rows, tr),)

    out2d = pl.pallas_call(
        _neg_kernel,
        out_shape=jax.ShapeDtypeStruct((rows, lanes), x.dtype),
        grid_spec=pltpu.PrefetchScalarGridSpec(
            num_scalar_prefetch=0,
            grid=grid,
            in_specs=[pl.BlockSpec((tr, lanes), lambda i: (i, 0))],
            out_specs=pl.BlockSpec((tr, lanes), lambda i: (i, 0)),
        ),
        compiler_params=pltpu.CompilerParams(
            dimension_semantics=("parallel",),
        ),
        cost_estimate=pl.CostEstimate(
            flops=n, transcendentals=0, bytes_accessed=2 * n * itemsize
        ),
    )(x2d)

    return out2d.reshape(x.shape)


class ReModelTest:
    """JAX analogue of re_model_test: negate the recognition model's output.

    Only the `-1.0 *` scaling that re_model_test itself performs is a Pallas
    kernel; the recognition model REC is injected, as in the PyTorch module.
    """

    # TODO(synk): REC.encode_loss / REC.initialize_posterior_distribution are an
    # external, unspecified sub-module; they have no Pallas translation here and
    # are taken as user-supplied callables.
    def __init__(self, encode_loss_fn, initialize_posterior_fn, re_loss=False,
                 min_pallas_bytes: int = 256 * 1024):
        self._encode_loss = encode_loss_fn
        self._init_posterior = initialize_posterior_fn
        self.re_loss = re_loss
        self._min_pallas_bytes = min_pallas_bytes

    def forward(self, dataxz):
        datax, dataz = dataxz
        if self.re_loss:
            val = self._encode_loss(datax, dataz)
        else:
            val = self._init_posterior(datax)
        return neg_pallas(val, min_pallas_bytes=self._min_pallas_bytes)

    __call__ = forward


if __name__ == "__main__":
    key = jax.random.PRNGKey(0)
    k1, k2, k3, k4, k5 = jax.random.split(key, 5)

    # --- direct kernel checks -------------------------------------------------
    # Small, module-consistent shape; force the Pallas path (min_pallas_bytes=0).
    x_small = jax.random.normal(k1, (2, 4, 16, 16), dtype=jnp.float32)
    y_small = jax.block_until_ready(neg_pallas(x_small, min_pallas_bytes=0))
    assert y_small.shape == x_small.shape and y_small.dtype == x_small.dtype
    assert jnp.allclose(y_small, -x_small), "small-input mismatch vs -x"

    # Larger aligned case: ~2 MiB blocks, lane dim 2048, even multi-step grid.
    x_big = jax.random.normal(k2, (2, 4, 256, 512), dtype=jnp.float32)  # 4 MiB
    y_big = jax.block_until_ready(neg_pallas(x_big))
    assert jnp.allclose(y_big, -x_big), "big-input mismatch vs -x"

    # Ragged-masked multi-step grid: rows=17 with 8-row blocks -> 3 grid steps,
    # final block masked by Pallas (exercised via a small block_bytes override).
    x_ragged = jax.random.normal(k5, (17, 8, 128), dtype=jnp.float32)
    y_ragged = jax.block_until_ready(
        neg_pallas(x_ragged, min_pallas_bytes=0, block_bytes=32 * 1024))
    assert jnp.allclose(y_ragged, -x_ragged), "ragged-grid mismatch vs -x"

    # Non-tileable size exercises the jnp fallback.
    x_odd = jax.random.normal(k3, (3, 5, 7), dtype=jnp.float32)
    y_odd = jax.block_until_ready(neg_pallas(x_odd))
    assert jnp.allclose(y_odd, -x_odd), "fallback mismatch vs -x"

    # --- module forward (both branches) --------------------------------------
    datax = jax.random.normal(k4, (16, 64), dtype=jnp.float32)
    dataz = jax.random.normal(k1, (16, 8), dtype=jnp.float32)

    # Deterministic stand-ins for the unspecified REC sub-module (test-only).
    def _standin_init_posterior(dx):
        return dx * 0.5 + 1.0

    def _standin_encode_loss(dx, dz):
        return jnp.sum(dx * dx) * 0.5 + jnp.sum(dz * dz) * 0.25

    model_post = ReModelTest(_standin_encode_loss, _standin_init_posterior,
                             re_loss=False, min_pallas_bytes=0)
    out_post = jax.block_until_ready(model_post((datax, dataz)))
    assert jnp.allclose(out_post, -1.0 * _standin_init_posterior(datax))

    model_loss = ReModelTest(_standin_encode_loss, _standin_init_posterior,
                             re_loss=True)
    out_loss = jax.block_until_ready(model_loss((datax, dataz)))
    assert jnp.allclose(out_loss, -1.0 * _standin_encode_loss(datax, dataz))

    print("KERNEL_OK")
</pallas_src>

<mosaic_0001>
module attributes {stable_mosaic.version = 11 : i64} {
  func.func @_neg_kernel(%arg0: i32, %arg1: memref<1x2048xf32, #tpu.memory_space<vmem>>, %arg2: memref<1x2048xf32, #tpu.memory_space<vmem>>) attributes {dimension_semantics = [#tpu.dimension_semantics<parallel>], iteration_bounds = array<i64: 1>, scalar_prefetch = 0 : i64, scratch_operands = 0 : i64, tpu.core_type = #tpu.core_type<tc>, window_params = [{transform_indices = @transform_0, window_bounds = array<i64: 1, 2048>}, {transform_indices = @transform_1, window_bounds = array<i64: 1, 2048>}]} {
    %c0 = arith.constant 0 : index
    %c0_0 = arith.constant 0 : index
    %0 = vector.load %arg1[%c0, %c0_0] : memref<1x2048xf32, #tpu.memory_space<vmem>>, vector<1x2048xf32>
    %cst = arith.constant 0.000000e+00 : f32
    %1 = vector.broadcast %cst : f32 to vector<1x2048xf32>
    %2 = arith.subf %1, %0 : vector<1x2048xf32>
    %c0_1 = arith.constant 0 : index
    %c0_2 = arith.constant 0 : index
    %3 = vector.load %arg2[%c0_1, %c0_2] : memref<1x2048xf32, #tpu.memory_space<vmem>>, vector<1x2048xf32>
    tpu.vector_store %arg2[%c0_1, %c0_2], %2 {strides = array<i32>} : memref<1x2048xf32, #tpu.memory_space<vmem>>, vector<1x2048xf32>,
    return
  }
  func.func @transform_0(%arg0: i32) -> (i32, i32) {
    %c0_i32 = arith.constant 0 : i32
    %c0_i32_0 = arith.constant 0 : i32
    return %arg0, %c0_i32 : i32, i32
  }
  func.func @transform_1(%arg0: i32) -> (i32, i32) {
    %c0_i32 = arith.constant 0 : i32
    %c0_i32_0 = arith.constant 0 : i32
    return %arg0, %c0_i32 : i32, i32
  }
}

</mosaic_0001>

<bundles_post_ra>
// kernel: tpu_custom_call.1
= control target key start
LH: loop header
LB: loop body
LE: loop exit
PB: predicated region body
PF: predicated region fallthrough
CT: control target
= control target key end

     0   :  { %6 = vsyncpa [#allocation3], 0  ;;  %s128_s0 = inlined_call_operand.hbm [shape: f32[1,2048], index: 0, kind: input, shape index: {}]   ;;  %s129_s1 = inlined_call_operand.hbm [shape: f32[1,2048], index: 1, kind: output, shape index: {}]  }
   0x1   :  { %7 = vsyncpa [#allocation4], 0  ;;  %s92_s6 = smov [#allocation2]   ;;  %s44_s10 = scalar_lea.hbm %s128_s0, 256 }
   0x2   :  { %s14_s7 = sshll.u32 %s92_s6, 4  ;;  %p45_p0 = scmp.ne.s32.totalorder %s128_s0, %s44_s10  ;;  %s15_s7 = int_to_ptr.vmem [resolvable:$true] %s14_s7 }
   0x3   :  { %p48_p1 = scmp.lt.u32.totalorder %s44_s10, %s128_s0 }
   0x5   :  { %p50_p2 = pnand %p48_p1, %p45_p0 }
   0x7   :  { %53 = shalt.err (!%p50_p2)
}
   0x8   :  { %s54_s15 = scalar_lea.vmem %s15_s7, 256  ;;  %p59_p4 = scmp.lt.s32.totalorder %s15_s7, %s15_s7 }
   0x9   :  { %p55_p3 = scmp.ne.s32.totalorder %s15_s7, %s54_s15  ;;  %p60_p5 = scmp.lt.s32.totalorder %s54_s15, %s54_s15 }
   0xb   :  { %p61_p6 = por %p60_p5, %p59_p4 }
   0xd   :  { %p62_p7 = pnand %p61_p6, %p55_p3 }
   0xf   :  { %65 = shalt.err (!%p62_p7)
}
  0x10   :  { %17 = dma.hbm_to_vmem [thread:$0]  %s128_s0, 256, %s15_s7, [#allocation3]  }
  0x11   :  { %88 = dma.done.wait [#allocation3], 256  }
  0x12   :  { %89 = vsyncadd [#allocation3], 4294967040  ;;  %s93_s18 = smov [#allocation5]   ;;  %v21_v0 = vld [vmem:[#allocation2] sm:$0xff]  ;;  %v22_v1 = vld [vmem:[#allocation2 + $0x8] sm:$0xff] }
  0x13   :  { %s33_s19 = sshll.u32 %s93_s18, 4  ;;  %v23_v2 = vsub.f32 0.0, %v21_v0  ;;  %v24_v3 = vsub.f32 0.0, %v22_v1  ;;  %s34_s19 = int_to_ptr.vmem [resolvable:$true] %s33_s19 }
  0x14   :  { %s66_s20 = scalar_lea.vmem %s34_s19, 256  ;;  %p71_p9 = scmp.lt.s32.totalorder %s34_s19, %s34_s19 }
  0x15   :  { %25 = vst [vmem:[#allocation5] sm:$0xff] %v23_v2  ;;  %26 = vst [vmem:[#allocation5 + $0x8] sm:$0xff] %v24_v3  ;;  %p67_p8 = scmp.ne.s32.totalorder %s34_s19, %s66_s20  ;;  %p72_p10 = scmp.lt.s32.totalorder %s66_s20, %s66_s20 }
  0x17   :  { %p73_p11 = por %p72_p10, %p71_p9 }
  0x19   :  { %p74_p12 = pnand %p73_p11, %p67_p8 }
  0x1b   :  { %77 = shalt.err (!%p74_p12)
}
  0x1c   :  { %s78_s22 = scalar_lea.hbm %s129_s1, 256 }
  0x1d   :  { %p79_p13 = scmp.ne.s32.totalorder %s129_s1, %s78_s22  ;;  %p82_p0 = scmp.lt.u32.totalorder %s78_s22, %s129_s1 }
  0x1f   :  { %p84_p1 = pnand %p82_p0, %p79_p13 }
  0x21   :  { %87 = shalt.err (!%p84_p1)
}
  0x22   :  { %36 = dma.vmem_to_hbm [thread:$0]  %s34_s19, 256, %s129_s1, [#allocation4]  }
  0x23   :  { %90 = dma.done.wait [#allocation4], 256  }
  0x24   :  { %91 = vsyncadd [#allocation4], 4294967040 }
  0x25   :  { %40 = vsyncpa [#allocation3], 1 }
  0x26   :  { %41 = vsyncpa [#allocation4], 1 }

</bundles_post_ra>
